<compile_context>
chip_gen: v7x
topology: tpu7x:2x2x1
jax: 0.10.0
libtpu: 0.0.40
codegen_flags: <defaults>
</compile_context>

<pallas_src>
import jax
import jax.numpy as jnp
from jax.experimental import pallas as pl
from jax.experimental.pallas import tpu as pltpu


LANES = 512       # lane-dense last dim (multiple of 128 -> unmasked stores)
TILE_ROWS = 512   # rows per block (multiple of 8); (512, 512) f32 block = 1 MiB


def _third_deriv_kernel(coef_ref, p2_ref, p1_ref, m1_ref, m2_ref, o_ref):
    # coef_ref: (4,) f32 in SMEM = [0.5/dx^3, -1.0/dx^3, 1.0/dx^3, -0.5/dx^3]
    c_p2 = coef_ref[0]
    c_p1 = coef_ref[1]
    c_m1 = coef_ref[2]
    c_m2 = coef_ref[3]
    p2 = p2_ref[...].astype(jnp.float32)
    p1 = p1_ref[...].astype(jnp.float32)
    m1 = m1_ref[...].astype(jnp.float32)
    m2 = m2_ref[...].astype(jnp.float32)
    # Same multiply/sum order as the reference expression (left-assoc).
    out = c_p2 * p2 + c_p1 * p1 + c_m1 * m1 + c_m2 * m2
    o_ref[...] = out.astype(o_ref.dtype)


def _to_2d(x):
    """Flatten to (rows, LANES); pad (only if needed) so lanes divide evenly."""
    flat = x.reshape(-1)
    n = flat.shape[0]
    rem = n % LANES
    if rem:
        flat = jnp.pad(flat, (0, LANES - rem))
    return flat.reshape(-1, LANES), n


class ThirdDerivSecondOrder:
    """Pallas-TPU port of the PyTorch ThirdDerivSecondOrder module."""

    def __init__(self, var: str, indep_var: str, out_name: str) -> None:
        self.var = var
        self.indep_var = indep_var
        self.out_name = out_name

    def __call__(self, inputs, dx: float):
        p2 = inputs[f"{self.var}>>{self.indep_var}::2"]
        p1 = inputs[f"{self.var}>>{self.indep_var}::1"]
        m1 = inputs[f"{self.var}>>{self.indep_var}::-1"]
        m2 = inputs[f"{self.var}>>{self.indep_var}::-2"]

        orig_shape = p2.shape
        orig_dtype = p2.dtype
        numel = p2.size

        p2_2d, _ = _to_2d(p2)
        p1_2d, _ = _to_2d(p1)
        m1_2d, _ = _to_2d(m1)
        m2_2d, _ = _to_2d(m2)

        rows = p2_2d.shape[0]
        # Block rows: either the full (small) row extent, or a big multiple of 8
        # with a cdiv grid handling the partial last block.
        block_rows = rows if rows < TILE_ROWS else TILE_ROWS
        grid = (pl.cdiv(rows, block_rows),)

        # Coefficients computed in host f64, exactly matching the reference
        # `0.5 / dx**3 * x` (scalar is then rounded once to f32).
        dx3 = dx ** 3
        coefs = jnp.asarray(
            [0.5 / dx3, -1.0 / dx3, 1.0 / dx3, -0.5 / dx3], dtype=jnp.float32
        )

        tile_spec = pl.BlockSpec((block_rows, LANES), lambda i: (i, 0))

        cost = pl.CostEstimate(
            flops=7 * numel,
            transcendentals=0,
            bytes_accessed=5 * numel * p2.dtype.itemsize,
        )

        out_2d = pl.pallas_call(
            _third_deriv_kernel,
            out_shape=jax.ShapeDtypeStruct((rows, LANES), orig_dtype),
            grid=grid,
            in_specs=[
                pl.BlockSpec(memory_space=pltpu.MemorySpace.SMEM),  # coefficients
                tile_spec,
                tile_spec,
                tile_spec,
                tile_spec,
            ],
            out_specs=tile_spec,
            compiler_params=pltpu.CompilerParams(
                dimension_semantics=("parallel",)
            ),
            cost_estimate=cost,
        )(coefs, p2_2d, p1_2d, m1_2d, m2_2d)

        out = out_2d.reshape(-1)[:numel].reshape(orig_shape)
        return {self.out_name: out}


def _reference(inputs, dx, var, indep_var):
    return (
        0.5 / dx**3 * inputs[f"{var}>>{indep_var}::2"]
        + -1.0 / dx**3 * inputs[f"{var}>>{indep_var}::1"]
        + 1.0 / dx**3 * inputs[f"{var}>>{indep_var}::-1"]
        + -0.5 / dx**3 * inputs[f"{var}>>{indep_var}::-2"]
    )


if __name__ == "__main__":
    key = jax.random.PRNGKey(0)
    k1, k2, k3, k4 = jax.random.split(key, 4)

    # NCHW fields, batch=2, channels=4, spatial=16x16
    shape = (2, 4, 16, 16)
    var, indep_var, out_name = "u", "x", "u__x__x__x"
    inputs = {
        f"{var}>>{indep_var}::2": jax.random.normal(k1, shape, dtype=jnp.float32),
        f"{var}>>{indep_var}::1": jax.random.normal(k2, shape, dtype=jnp.float32),
        f"{var}>>{indep_var}::-1": jax.random.normal(k3, shape, dtype=jnp.float32),
        f"{var}>>{indep_var}::-2": jax.random.normal(k4, shape, dtype=jnp.float32),
    }
    dx = 0.1

    mod = ThirdDerivSecondOrder(var, indep_var, out_name)
    out = mod(inputs, dx)[out_name]
    out = jax.block_until_ready(out)

    ref = _reference(inputs, dx, var, indep_var)
    assert out.shape == shape and out.dtype == jnp.float32
    assert jnp.allclose(out, ref, rtol=1e-5, atol=1e-4), "mismatch vs reference"

    print("KERNEL_OK")
</pallas_src>

<mosaic_0001>
module attributes {stable_mosaic.version = 11 : i64} {
  func.func @_third_deriv_kernel(%arg0: i32, %arg1: memref<4xf32, #tpu.memory_space<smem>>, %arg2: memref<4x512xf32, #tpu.memory_space<vmem>>, %arg3: memref<4x512xf32, #tpu.memory_space<vmem>>, %arg4: memref<4x512xf32, #tpu.memory_space<vmem>>, %arg5: memref<4x512xf32, #tpu.memory_space<vmem>>, %arg6: memref<4x512xf32, #tpu.memory_space<vmem>>) attributes {dimension_semantics = [#tpu.dimension_semantics<parallel>], iteration_bounds = array<i64: 1>, scalar_prefetch = 0 : i64, scratch_operands = 0 : i64, tpu.core_type = #tpu.core_type<tc>, window_params = [{transform_indices = @transform_0, window_bounds = array<i64: 4>}, {transform_indices = @transform_1, window_bounds = array<i64: 4, 512>}, {transform_indices = @transform_2, window_bounds = array<i64: 4, 512>}, {transform_indices = @transform_3, window_bounds = array<i64: 4, 512>}, {transform_indices = @transform_4, window_bounds = array<i64: 4, 512>}, {transform_indices = @transform_5, window_bounds = array<i64: 4, 512>}]} {
    %c0 = arith.constant 0 : index
    %0 = memref.load %arg1[%c0] : memref<4xf32, #tpu.memory_space<smem>>
    %c1 = arith.constant 1 : index
    %1 = memref.load %arg1[%c1] : memref<4xf32, #tpu.memory_space<smem>>
    %c2 = arith.constant 2 : index
    %2 = memref.load %arg1[%c2] : memref<4xf32, #tpu.memory_space<smem>>
    %c3 = arith.constant 3 : index
    %3 = memref.load %arg1[%c3] : memref<4xf32, #tpu.memory_space<smem>>
    %c0_0 = arith.constant 0 : index
    %c0_1 = arith.constant 0 : index
    %4 = vector.load %arg2[%c0_0, %c0_1] : memref<4x512xf32, #tpu.memory_space<vmem>>, vector<4x512xf32>
    %c0_2 = arith.constant 0 : index
    %c0_3 = arith.constant 0 : index
    %5 = vector.load %arg3[%c0_2, %c0_3] : memref<4x512xf32, #tpu.memory_space<vmem>>, vector<4x512xf32>
    %c0_4 = arith.constant 0 : index
    %c0_5 = arith.constant 0 : index
    %6 = vector.load %arg4[%c0_4, %c0_5] : memref<4x512xf32, #tpu.memory_space<vmem>>, vector<4x512xf32>
    %c0_6 = arith.constant 0 : index
    %c0_7 = arith.constant 0 : index
    %7 = vector.load %arg5[%c0_6, %c0_7] : memref<4x512xf32, #tpu.memory_space<vmem>>, vector<4x512xf32>
    %8 = vector.broadcast %0 : f32 to vector<4x512xf32>
    %9 = arith.mulf %8, %4 : vector<4x512xf32>
    %10 = vector.broadcast %1 : f32 to vector<4x512xf32>
    %11 = arith.mulf %10, %5 : vector<4x512xf32>
    %12 = arith.addf %9, %11 : vector<4x512xf32>
    %13 = vector.broadcast %2 : f32 to vector<4x512xf32>
    %14 = arith.mulf %13, %6 : vector<4x512xf32>
    %15 = arith.addf %12, %14 : vector<4x512xf32>
    %16 = vector.broadcast %3 : f32 to vector<4x512xf32>
    %17 = arith.mulf %16, %7 : vector<4x512xf32>
    %18 = arith.addf %15, %17 : vector<4x512xf32>
    %c0_8 = arith.constant 0 : index
    %c0_9 = arith.constant 0 : index
    %19 = vector.load %arg6[%c0_8, %c0_9] : memref<4x512xf32, #tpu.memory_space<vmem>>, vector<4x512xf32>
    tpu.vector_store %arg6[%c0_8, %c0_9], %18 {strides = array<i32>} : memref<4x512xf32, #tpu.memory_space<vmem>>, vector<4x512xf32>,
    return
  }
  func.func @transform_0(%arg0: i32) -> i32 {
    %c0_i32 = arith.constant 0 : i32
    %c0_i32_0 = arith.constant 0 : i32
    return %c0_i32 : i32
  }
  func.func @transform_1(%arg0: i32) -> (i32, i32) {
    %c0_i32 = arith.constant 0 : i32
    %c0_i32_0 = arith.constant 0 : i32
    return %arg0, %c0_i32 : i32, i32
  }
  func.func @transform_2(%arg0: i32) -> (i32, i32) {
    %c0_i32 = arith.constant 0 : i32
    %c0_i32_0 = arith.constant 0 : i32
    return %arg0, %c0_i32 : i32, i32
  }
  func.func @transform_3(%arg0: i32) -> (i32, i32) {
    %c0_i32 = arith.constant 0 : i32
    %c0_i32_0 = arith.constant 0 : i32
    return %arg0, %c0_i32 : i32, i32
  }
  func.func @transform_4(%arg0: i32) -> (i32, i32) {
    %c0_i32 = arith.constant 0 : i32
    %c0_i32_0 = arith.constant 0 : i32
    return %arg0, %c0_i32 : i32, i32
  }
  func.func @transform_5(%arg0: i32) -> (i32, i32) {
    %c0_i32 = arith.constant 0 : i32
    %c0_i32_0 = arith.constant 0 : i32
    return %arg0, %c0_i32 : i32, i32
  }
}

</mosaic_0001>

<bundles_post_ra>
// kernel: tpu_custom_call.1
= control target key start
LH: loop header
LB: loop body
LE: loop exit
PB: predicated region body
PF: predicated region fallthrough
CT: control target
= control target key end

     0   :  { %10 = vsyncpa [#allocation5], 0  ;;  %s376_s0 = inlined_call_operand.hbm [shape: f32[4], index: 0, kind: input, shape index: {}]   ;;  %s377_s1 = inlined_call_operand.hbm [shape: f32[4,512], index: 1, kind: input, shape index: {}]   ;;  %s378_s2 = inlined_call_operand.hbm [shape: f32[4,512], index: 2, kind: input, shape index: {}]   ;;  %s379_s3 = inlined_call_operand.hbm [shape: f32[4,512], index: 3, kind: input, shape index: {}]   ;;  %s380_s4 = inlined_call_operand.hbm [shape: f32[4,512], index: 4, kind: input, shape index: {}]   ;;  %s381_s5 = inlined_call_operand.hbm [shape: f32[4,512], index: 5, kind: output, shape index: {}]  }
   0x1   :  { %11 = vsyncpa [#allocation3], 0 }
   0x2   :  { %12 = vsyncpa [#allocation8], 0 }
   0x3   :  { %13 = vsyncpa [#allocation11], 0 }
   0x4   :  { %14 = vsyncpa [#allocation4], 0  ;;  %s268_s18 = smov [#allocation7]   ;;  %s269_s20 = smov [#allocation6]  }
   0x5   :  { %s39_s19 = sshll.u32 %s268_s18, 4  ;;  %s29_s21 = sshll.u32 %s269_s20, 4  ;;  %s40_s19 = int_to_ptr.vmem [resolvable:$true] %s39_s19  ;;  %s30_s21 = int_to_ptr.vmem [resolvable:$true] %s29_s21 }
   0x6   :  { %s138_s24 = scalar_lea.hbm %s378_s2, 256 }
   0x7   :  { %p139_p0 = scmp.ne.s32.totalorder %s378_s2, %s138_s24  ;;  %p142_p1 = scmp.lt.u32.totalorder %s138_s24, %s378_s2 }
   0x9   :  { %p144_p2 = pnand %p142_p1, %p139_p0 }
   0xb   :  { %147 = shalt.err (!%p144_p2)
}
   0xc   :  { %s148_s29 = scalar_lea.vmem %s40_s19, 256  ;;  %p153_p4 = scmp.lt.s32.totalorder %s40_s19, %s40_s19 }
   0xd   :  { %p149_p3 = scmp.ne.s32.totalorder %s40_s19, %s148_s29  ;;  %p154_p5 = scmp.lt.s32.totalorder %s148_s29, %s148_s29 }
   0xf   :  { %p155_p6 = por %p154_p5, %p153_p4 }
  0x11   :  { %p156_p7 = pnand %p155_p6, %p149_p3 }
  0x13   :  { %159 = shalt.err (!%p156_p7)
}
  0x14   :  { %42 = dma.hbm_to_vmem [thread:$0]  %s378_s2, 256, %s40_s19, [#allocation8]  }
  0x15   :  { %s160_s9 = scalar_lea.hbm %s376_s0, 16 }
  0x16   :  { %p161_p8 = scmp.ne.s32.totalorder %s376_s0, %s160_s9  ;;  %p164_p9 = scmp.lt.u32.totalorder %s160_s9, %s376_s0 }
  0x18   :  { %p166_p10 = pnand %p164_p9, %p161_p8 }
  0x1a   :  { %169 = shalt.err (!%p166_p10)
}
  0x1b   :  { %s270_s14 = smov [#allocation2]   ;;  %s170_s18 = scalar_lea.hbm %s377_s1, 256 }
  0x1c   :  { %22 = dma.hbm_to_smem %s376_s0, 16, %s270_s14, [#allocation5]  }
  0x1d   :  { %p171_p11 = scmp.ne.s32.totalorder %s377_s1, %s170_s18  ;;  %p174_p12 = scmp.lt.u32.totalorder %s170_s18, %s377_s1 }
  0x1f   :  { %p176_p13 = pnand %p174_p12, %p171_p11 }
  0x21   :  { %179 = shalt.err (!%p176_p13)
}
  0x22   :  { %s180_s24 = scalar_lea.vmem %s30_s21, 256  ;;  %p185_p1 = scmp.lt.s32.totalorder %s30_s21, %s30_s21 }
  0x23   :  { %p181_p0 = scmp.ne.s32.totalorder %s30_s21, %s180_s24  ;;  %p186_p2 = scmp.lt.s32.totalorder %s180_s24, %s180_s24 }
  0x25   :  { %p187_p3 = por %p186_p2, %p185_p1 }
  0x27   :  { %p188_p4 = pnand %p187_p3, %p181_p0 }
  0x29   :  { %191 = shalt.err (!%p188_p4)
}
  0x2a   :  { %32 = dma.hbm_to_vmem [thread:$0]  %s377_s1, 256, %s30_s21, [#allocation3]  }
  0x2b   :  { %s271_s26 = smov [#allocation9]   ;;  %s272_s28 = smov [#allocation10]  }
  0x2c   :  { %s49_s27 = sshll.u32 %s271_s26, 4  ;;  %s59_s29 = sshll.u32 %s272_s28, 4  ;;  %s50_s27 = int_to_ptr.vmem [resolvable:$true] %s49_s27  ;;  %s60_s29 = int_to_ptr.vmem [resolvable:$true] %s59_s29 }
  0x2d   :  { %s192_s7 = scalar_lea.hbm %s379_s3, 256 }
  0x2e   :  { %p193_p5 = scmp.ne.s32.totalorder %s379_s3, %s192_s7  ;;  %p196_p6 = scmp.lt.u32.totalorder %s192_s7, %s379_s3 }
  0x30   :  { %p198_p7 = pnand %p196_p6, %p193_p5 }
  0x32   :  { %201 = shalt.err (!%p198_p7)
}
  0x33   :  { %s202_s1 = scalar_lea.vmem %s50_s27, 256  ;;  %p207_p9 = scmp.lt.s32.totalorder %s50_s27, %s50_s27 }
  0x34   :  { %p203_p8 = scmp.ne.s32.totalorder %s50_s27, %s202_s1  ;;  %p208_p10 = scmp.lt.s32.totalorder %s202_s1, %s202_s1 }
  0x36   :  { %p209_p11 = por %p208_p10, %p207_p9 }
  0x38   :  { %p210_p12 = pnand %p209_p11, %p203_p8 }
  0x3a   :  { %213 = shalt.err (!%p210_p12)
}
  0x3b   :  { %52 = dma.hbm_to_vmem [thread:$0]  %s379_s3, 256, %s50_s27, [#allocation8]  }
  0x3c   :  { %s214_s15 = scalar_lea.hbm %s380_s4, 256 }
  0x3d   :  { %p215_p13 = scmp.ne.s32.totalorder %s380_s4, %s214_s15  ;;  %p218_p0 = scmp.lt.u32.totalorder %s214_s15, %s380_s4 }
  0x3f   :  { %p220_p1 = pnand %p218_p0, %p215_p13 }
  0x41   :  { %223 = shalt.err (!%p220_p1)
}
  0x42   :  { %s224_s19 = scalar_lea.vmem %s60_s29, 256  ;;  %p229_p3 = scmp.lt.s32.totalorder %s60_s29, %s60_s29 }
  0x43   :  { %p225_p2 = scmp.ne.s32.totalorder %s60_s29, %s224_s19  ;;  %p230_p4 = scmp.lt.s32.totalorder %s224_s19, %s224_s19 }
  0x45   :  { %p231_p5 = por %p230_p4, %p229_p3 }
  0x47   :  { %p232_p6 = pnand %p231_p5, %p225_p2 }
  0x49   :  { %235 = shalt.err (!%p232_p6)
}
  0x4a   :  { %62 = dma.hbm_to_vmem [thread:$0]  %s380_s4, 256, %s60_s29, [#allocation11]  }
  0x4b   :  { %258 = dma.done.wait [#allocation5], 16  }
  0x4c   :  { %259 = vsyncadd [#allocation5], 4294967280 }
  0x4d   :  { %260 = dma.done.wait [#allocation3], 256  }
  0x4e   :  { %261 = vsyncadd [#allocation3], 4294967040 }
  0x4f   :  { %262 = dma.done.wait [#allocation8], 512  }
  0x50   :  { %263 = vsyncadd [#allocation8], 4294966784 }
  0x51   :  { %264 = dma.done.wait [#allocation11], 256  }
  0x52   :  { %265 = vsyncadd [#allocation11], 4294967040 }
  0x53   :  { %78 = sfence }
  0x54   :  { %s79_s22 = sld [smem:[#allocation2]]  ;;  %s129_s23 = sld [smem:[#allocation2 + $0x1]]  ;;  %v83_v0 = vld [vmem:[#allocation6] sm:$0xff]  ;;  %v85_v1 = vld [vmem:[#allocation7] sm:$0xff]  ;;  %v84_v3 = vld [vmem:[#allocation6 + $0x8] sm:$0xff] }
  0x55   :  { %s130_s24 = sld [smem:[#allocation2 + $0x2]]  ;;  %s131_s0 = sld [smem:[#allocation2 + $0x3]]  ;;  %v87_v2 = vld [vmem:[#allocation9] sm:$0xff]  ;;  %v86_v4 = vld [vmem:[#allocation7 + $0x8] sm:$0xff]  ;;  %v89_v5 = vld [vmem:[#allocation10] sm:$0xff] }
  0x56   :  { %v88_v8 = vld [vmem:[#allocation9 + $0x8] sm:$0xff]  ;;  %v90_v13 = vld [vmem:[#allocation10 + $0x8] sm:$0xff]  ;;  %s273_s4 = smov [#allocation12]  }
  0x57   :  { %s117_s25 = sshll.u32 %s273_s4, 4  ;;  %s118_s25 = int_to_ptr.vmem [resolvable:$true] %s117_s25 }
  0x58   :  { %s236_s26 = scalar_lea.vmem %s118_s25, 256  ;;  %p241_p8 = scmp.lt.s32.totalorder %s118_s25, %s118_s25 }
  0x59   :  { %p237_p7 = scmp.ne.s32.totalorder %s118_s25, %s236_s26  ;;  %p242_p9 = scmp.lt.s32.totalorder %s236_s26, %s236_s26 }
  0x5a   :  { %v91_v6 = vstv %s79_s22  ;;  %v94_v7 = vstv %s129_s23 }
  0x5b   :  { %v92_v9 = vmul.f32 %v91_v6, %v83_v0  ;;  %v95_v10 = vmul.f32 %v94_v7, %v85_v1  ;;  %v99_v11 = vstv %s130_s24  ;;  %v104_v12 = vstv %s131_s0  ;;  %p243_p10 = por %p242_p9, %p241_p8 }
  0x5c   :  { %v100_v14 = vmul.f32 %v99_v11, %v87_v2  ;;  %v93_v15 = vmul.f32 %v91_v6, %v84_v3  ;;  %v96_v16 = vmul.f32 %v94_v7, %v86_v4  ;;  %v105_v18 = vmul.f32 %v104_v12, %v89_v5 }
  0x5d   :  { %v97_v17 = vadd.f32 %v95_v10, %v92_v9  ;;  %v101_v19 = vmul.f32 %v99_v11, %v88_v8  ;;  %v106_v21 = vmul.f32 %v104_v12, %v90_v13  ;;  %p244_p11 = pnand %p243_p10, %p237_p7 }
  0x5e   :  { %v98_v20 = vadd.f32 %v96_v16, %v93_v15 }
  0x5f   :  { %v102_v22 = vadd.f32 %v100_v14, %v97_v17 }
  0x60   :  { %v103_v23 = vadd.f32 %v101_v19, %v98_v20 }
  0x61   :  { %v107_v24 = vadd.f32 %v105_v18, %v102_v22 }
  0x62   :  { %v108_v25 = vadd.f32 %v106_v21, %v103_v23 }
  0x63   :  { %109 = vst [vmem:[#allocation12] sm:$0xff] %v107_v24 }
  0x64   :  { %110 = vst [vmem:[#allocation12 + $0x8] sm:$0xff] %v108_v25 }
  0x65   :  { %247 = shalt.err (!%p244_p11)
}
  0x66   :  { %s248_s29 = scalar_lea.hbm %s381_s5, 256 }
  0x67   :  { %p249_p12 = scmp.ne.s32.totalorder %s381_s5, %s248_s29  ;;  %p252_p13 = scmp.lt.u32.totalorder %s248_s29, %s381_s5 }
  0x69   :  { %p254_p0 = pnand %p252_p13, %p249_p12 }
  0x6b   :  { %257 = shalt.err (!%p254_p0)
}
  0x6c   :  { %120 = dma.vmem_to_hbm [thread:$0]  %s118_s25, 256, %s381_s5, [#allocation4]  }
  0x6d   :  { %266 = dma.done.wait [#allocation4], 256  }
  0x6e   :  { %267 = vsyncadd [#allocation4], 4294967040 }
  0x6f   :  { %124 = vsyncpa [#allocation3], 1 }
  0x70   :  { %125 = vsyncpa [#allocation8], 1 }
  0x71   :  { %126 = vsyncpa [#allocation11], 1 }
  0x72   :  { %127 = vsyncpa [#allocation4], 1 }
  0x73   :  { %128 = vsyncpa [#allocation5], 1 }

</bundles_post_ra>
